<compile_context>
chip_gen: v7x
topology: tpu7x:2x2x1
jax: 0.10.0
libtpu: 0.0.40
codegen_flags: <defaults>
</compile_context>

<pallas_src>
import functools

import numpy as np
import jax
import jax.numpy as jnp
from jax.experimental import pallas as pl
from jax.experimental.pallas import tpu as pltpu


# ---------------------------------------------------------------------------
# Fused kernel: input projection (prologue) + bidirectional LSTM recurrence
# (fori_loop over T) + MLP head (epilogue).  Single invocation, no grid.
# ---------------------------------------------------------------------------
def _bilstm_mlp_kernel(xp_ref, wih_ref, b_ref, whh_ref,
                       w1_ref, b1_ref, w2_ref, b2_ref,
                       out_ref, gin_ref, *, T, B):
    # Shapes (all f32, all VMEM resident):
    #   xp_ref : (T*B, 2D)   x_pair[t] = [x[t] | x[T-1-t]]
    #   wih_ref: (2D, 8H)    combined input weights, gate-block layout
    #   b_ref  : (1, 8H)     combined biases
    #   whh_ref: (2H, 8H)    block-diagonal combined recurrent weights
    #   w1_ref : (2H, H1), b1_ref: (1, H1), w2_ref: (1, H1), b2_ref: (1, 1)
    #   out_ref: (B, 1)
    #   gin_ref: (T*B, 8H)   precomputed per-step input gates (scratch)
    # Gate column layout (width H each): [i_f, i_b, f_f, f_b, o_f, o_b, g_f, g_b]
    H2 = whh_ref.shape[0]          # 2H  (fwd | bwd hidden, concatenated)

    # ---- prologue: hoisted input projection — one big MXU matmul ----------
    gin_ref[...] = (
        jnp.dot(xp_ref[...], wih_ref[...], preferred_element_type=jnp.float32)
        + b_ref[...])

    whh = whh_ref[...]             # hoist recurrent weight load out of the loop

    # ---- recurrence: only h @ Whh is on the serial critical path ----------
    def step(t, carry):
        h, c = carry                                   # each (B, 2H)
        gates = gin_ref[pl.ds(t * B, B), :] + jnp.dot(
            h, whh, preferred_element_type=jnp.float32)          # (B, 8H)
        sig = jax.nn.sigmoid(gates[:, 0:3 * H2])       # contiguous i|f|o block
        g = jnp.tanh(gates[:, 3 * H2:4 * H2])          # contiguous g block
        i = sig[:, 0:H2]
        f = sig[:, H2:2 * H2]
        o = sig[:, 2 * H2:3 * H2]
        c = f * c + i * g
        h = o * jnp.tanh(c)
        return (h, c)

    zeros = jnp.zeros((B, H2), jnp.float32)
    h, _ = jax.lax.fori_loop(0, T, step, (zeros, zeros), unroll=True)

    # h == concat([h_fwd_final, h_bwd_final], axis=-1)  -> features (B, 2H)

    # ---- fused MLP head: Linear(2H->H1) + ReLU + Linear(H1->1) ------------
    h1 = jnp.maximum(
        jnp.dot(h, w1_ref[...], preferred_element_type=jnp.float32)
        + b1_ref[...], 0.0)                            # (B, H1)
    # N=1 matmul replaced by VPU multiply + lane reduction (XLU slot).
    out_ref[...] = (jnp.sum(h1 * w2_ref[...], axis=-1, keepdims=True)
                    + b2_ref[...])                     # (B, 1)


# ---------------------------------------------------------------------------
# Parameter packing: build combined gate-block weights once.
#   PyTorch per-direction gate order is [i, f, g, o]; we repack columns into
#   [i_f, i_b, f_f, f_b, o_f, o_b, g_f, g_b] (sigmoid gates first, then tanh),
#   block-diagonal in the direction dimension.
# ---------------------------------------------------------------------------
def pack_params(params):
    H = params["whh_f"].shape[0]

    def split_gates(w):                   # -> [i, f, g, o], each (rows, H)
        return [w[:, k * H:(k + 1) * H] for k in range(4)]

    def blk(wf_g, wb_g):                  # block-diag (rows_f+rows_b, 2H)
        rf, rb = wf_g.shape[0], wb_g.shape[0]
        top = jnp.concatenate([wf_g, jnp.zeros((rf, H), jnp.float32)], axis=1)
        bot = jnp.concatenate([jnp.zeros((rb, H), jnp.float32), wb_g], axis=1)
        return jnp.concatenate([top, bot], axis=0)

    def combine(wf, wb):                  # -> (rows_f+rows_b, 8H), order [i,f,o,g]
        i_f, f_f, g_f, o_f = split_gates(wf)
        i_b, f_b, g_b, o_b = split_gates(wb)
        return jnp.concatenate(
            [blk(i_f, i_b), blk(f_f, f_b), blk(o_f, o_b), blk(g_f, g_b)], axis=1)

    bi_f = split_gates(params["b_f"])
    bi_b = split_gates(params["b_b"])
    b_full = jnp.concatenate(
        [jnp.concatenate([bi_f[0], bi_b[0]], axis=1),   # i
         jnp.concatenate([bi_f[1], bi_b[1]], axis=1),   # f
         jnp.concatenate([bi_f[3], bi_b[3]], axis=1),   # o
         jnp.concatenate([bi_f[2], bi_b[2]], axis=1)],  # g
        axis=1)                                         # (1, 8H)

    return {
        "wih": combine(params["wih_f"], params["wih_b"]),   # (2D, 8H)
        "whh": combine(params["whh_f"], params["whh_b"]),   # (2H, 8H)
        "b": b_full,                                        # (1, 8H)
        "w1": params["w1"],                                 # (2H, H1)
        "b1": params["b1"],                                 # (1, H1)
        "w2": params["w2"].T,                               # (1, H1)
        "b2": params["b2"],                                 # (1, 1)
    }


# ---------------------------------------------------------------------------
# Wrapper: one pallas_call, everything VMEM resident.
# ---------------------------------------------------------------------------
def bilstm_mlp_pallas(x, packed):
    """x: (T, B, D) f32 -> logits (B,) f32."""
    T, B, D = x.shape
    G = packed["whh"].shape[1]                    # 8H
    # Single input stream: x_pair[t] = [x[t] | x[T-1-t]]  -> (T*B, 2D)
    x_pair = jnp.concatenate([x, x[::-1]], axis=-1).reshape(T * B, 2 * D)

    kernel = functools.partial(_bilstm_mlp_kernel, T=T, B=B)
    out = pl.pallas_call(
        kernel,
        out_shape=jax.ShapeDtypeStruct((B, 1), jnp.float32),
        scratch_shapes=[pltpu.VMEM((T * B, G), jnp.float32)],
        compiler_params=pltpu.CompilerParams(vmem_limit_bytes=32 * 1024 * 1024),
    )(x_pair, packed["wih"], packed["b"], packed["whh"],
      packed["w1"], packed["b1"], packed["w2"], packed["b2"])
    return jnp.squeeze(out, axis=-1)


@jax.jit
def model_forward(x, packed):
    return bilstm_mlp_pallas(x, packed)


# ---------------------------------------------------------------------------
# Pure-JAX reference (uses the raw, un-packed parameters)
# ---------------------------------------------------------------------------
def _lstm_ref(x_seq, wih, whh, b, H):
    B = x_seq.shape[1]

    def step(carry, x_t):
        h, c = carry
        gates = x_t @ wih + h @ whh + b
        i = jax.nn.sigmoid(gates[:, 0 * H:1 * H])
        f = jax.nn.sigmoid(gates[:, 1 * H:2 * H])
        g = jnp.tanh(gates[:, 2 * H:3 * H])
        o = jax.nn.sigmoid(gates[:, 3 * H:4 * H])
        c = f * c + i * g
        h = o * jnp.tanh(c)
        return (h, c), None

    (h, _), _ = jax.lax.scan(step, (jnp.zeros((B, H), jnp.float32),
                                    jnp.zeros((B, H), jnp.float32)), x_seq)
    return h


def model_forward_ref(x, params):
    H = params["whh_f"].shape[0]
    hf = _lstm_ref(x, params["wih_f"], params["whh_f"], params["b_f"], H)
    hb = _lstm_ref(x[::-1], params["wih_b"], params["whh_b"], params["b_b"], H)
    feat = jnp.concatenate([hf, hb], axis=-1)
    h = jnp.maximum(feat @ params["w1"] + params["b1"], 0.0)
    return jnp.squeeze(h @ params["w2"] + params["b2"], axis=-1)


# ---------------------------------------------------------------------------
# Deterministic synthetic parameters (PyTorch layout: gate order [i, f, g, o])
# ---------------------------------------------------------------------------
def init_params(key, D, H, H1):
    ks = jax.random.split(key, 10)
    s = 0.1
    return {
        "wih_f": s * jax.random.normal(ks[0], (D, 4 * H), jnp.float32),
        "whh_f": s * jax.random.normal(ks[1], (H, 4 * H), jnp.float32),
        "b_f":   s * jax.random.normal(ks[2], (1, 4 * H), jnp.float32),
        "wih_b": s * jax.random.normal(ks[3], (D, 4 * H), jnp.float32),
        "whh_b": s * jax.random.normal(ks[4], (H, 4 * H), jnp.float32),
        "b_b":   s * jax.random.normal(ks[5], (1, 4 * H), jnp.float32),
        "w1":    s * jax.random.normal(ks[6], (2 * H, H1), jnp.float32),
        "b1":    s * jax.random.normal(ks[7], (1, H1), jnp.float32),
        "w2":    s * jax.random.normal(ks[8], (H1, 1), jnp.float32),
        "b2":    s * jax.random.normal(ks[9], (1, 1), jnp.float32),
    }


if __name__ == "__main__":
    # small shapes: seq=8, batch=8, input feature=16, lstm hidden=32, mlp=32
    T, B, D, H, H1 = 8, 8, 16, 32, 32

    key = jax.random.PRNGKey(0)
    kx, kp = jax.random.split(key)
    x = jax.random.normal(kx, (T, B, D), jnp.float32)   # time-major (T, B, D)
    params = init_params(kp, D, H, H1)
    packed = pack_params(params)

    logits = jax.block_until_ready(model_forward(x, packed))

    ref = model_forward_ref(x, params)
    assert logits.shape == (B,)
    np.testing.assert_allclose(np.asarray(logits), np.asarray(ref),
                               rtol=2e-3, atol=2e-3)

    # inference-time prediction, as in ModelDNNPytorch.test(): sigmoid(logits)
    _ = jax.block_until_ready(jax.nn.sigmoid(logits))

    print("KERNEL_OK")
</pallas_src>

<mosaic_0001>
module attributes {stable_mosaic.version = 11 : i64} {
  func.func @_bilstm_mlp_kernel(%arg0: memref<64x32xf32, #tpu.memory_space<vmem>>, %arg1: memref<32x256xf32, #tpu.memory_space<vmem>>, %arg2: memref<1x256xf32, #tpu.memory_space<vmem>>, %arg3: memref<64x256xf32, #tpu.memory_space<vmem>>, %arg4: memref<64x32xf32, #tpu.memory_space<vmem>>, %arg5: memref<1x32xf32, #tpu.memory_space<vmem>>, %arg6: memref<1x32xf32, #tpu.memory_space<vmem>>, %arg7: memref<1x1xf32, #tpu.memory_space<vmem>>, %arg8: memref<8x1xf32, #tpu.memory_space<vmem>>, %arg9: memref<64x256xf32, #tpu.memory_space<vmem>>) attributes {dimension_semantics = [], scalar_prefetch = 0 : i64, scratch_operands = 1 : i64, tpu.core_type = #tpu.core_type<tc>} {
    %c0 = arith.constant 0 : index
    %c0_0 = arith.constant 0 : index
    %0 = vector.load %arg0[%c0, %c0_0] : memref<64x32xf32, #tpu.memory_space<vmem>>, vector<64x32xf32>
    %c0_1 = arith.constant 0 : index
    %c0_2 = arith.constant 0 : index
    %1 = vector.load %arg1[%c0_1, %c0_2] : memref<32x256xf32, #tpu.memory_space<vmem>>, vector<32x256xf32>
    %cst = arith.constant dense<0.000000e+00> : vector<64x256xf32>
    %2 = tpu.matmul %0, %1, %cst {dimension_numbers = #tpu.dot_dimension_numbers<[1], [0], [0], [1], [0, 0, 1, 1], [], []>} : vector<64x32xf32>, vector<32x256xf32>, vector<64x256xf32> -> vector<64x256xf32>
    %c0_3 = arith.constant 0 : index
    %c0_4 = arith.constant 0 : index
    %3 = vector.load %arg2[%c0_3, %c0_4] : memref<1x256xf32, #tpu.memory_space<vmem>>, vector<1x256xf32>
    %4 = vector.broadcast %3 : vector<1x256xf32> to vector<64x256xf32>
    %5 = arith.addf %2, %4 : vector<64x256xf32>
    %c0_5 = arith.constant 0 : index
    %c0_6 = arith.constant 0 : index
    %6 = vector.load %arg9[%c0_5, %c0_6] : memref<64x256xf32, #tpu.memory_space<vmem>>, vector<64x256xf32>
    tpu.vector_store %arg9[%c0_5, %c0_6], %5 {strides = array<i32>} : memref<64x256xf32, #tpu.memory_space<vmem>>, vector<64x256xf32>,
    %c0_7 = arith.constant 0 : index
    %c0_8 = arith.constant 0 : index
    %7 = vector.load %arg3[%c0_7, %c0_8] : memref<64x256xf32, #tpu.memory_space<vmem>>, vector<64x256xf32>
    %cst_9 = arith.constant 0.000000e+00 : f32
    %8 = vector.broadcast %cst_9 : f32 to vector<8x64xf32>
    %c0_i32 = arith.constant 0 : i32
    %c8_i32 = arith.constant 8 : i32
    %9 = arith.muli %c0_i32, %c8_i32 : i32
    %10 = arith.index_cast %9 : i32 to index
    %c0_10 = arith.constant 0 : index
    %11 = vector.load %arg9[%10, %c0_10] : memref<64x256xf32, #tpu.memory_space<vmem>>, vector<8x256xf32>
    %cst_11 = arith.constant dense<0.000000e+00> : vector<8x256xf32>
    %12 = tpu.matmul %8, %7, %cst_11 {dimension_numbers = #tpu.dot_dimension_numbers<[1], [0], [0], [1], [0, 0, 1, 1], [], []>} : vector<8x64xf32>, vector<64x256xf32>, vector<8x256xf32> -> vector<8x256xf32>
    %13 = arith.addf %11, %12 : vector<8x256xf32>
    %14 = vector.extract_strided_slice %13 {offsets = [0, 0], sizes = [8, 192], strides = [1, 1]} : vector<8x256xf32> to vector<8x192xf32>
    %15 = arith.negf %14 : vector<8x192xf32>
    %16 = math.exp %15 : vector<8x192xf32>
    %cst_12 = arith.constant 1.000000e+00 : f32
    %17 = vector.broadcast %cst_12 : f32 to vector<8x192xf32>
    %18 = arith.addf %17, %16 : vector<8x192xf32>
    %19 = arith.divf %17, %18 : vector<8x192xf32>
    %20 = vector.extract_strided_slice %13 {offsets = [0, 192], sizes = [8, 64], strides = [1, 1]} : vector<8x256xf32> to vector<8x64xf32>
    %21 = math.tanh %20 : vector<8x64xf32>
    %22 = vector.extract_strided_slice %19 {offsets = [0, 0], sizes = [8, 64], strides = [1, 1]} : vector<8x192xf32> to vector<8x64xf32>
    %23 = vector.extract_strided_slice %19 {offsets = [0, 64], sizes = [8, 64], strides = [1, 1]} : vector<8x192xf32> to vector<8x64xf32>
    %24 = vector.extract_strided_slice %19 {offsets = [0, 128], sizes = [8, 64], strides = [1, 1]} : vector<8x192xf32> to vector<8x64xf32>
    %25 = arith.mulf %23, %8 : vector<8x64xf32>
    %26 = arith.mulf %22, %21 : vector<8x64xf32>
    %27 = arith.addf %25, %26 : vector<8x64xf32>
    %28 = math.tanh %27 : vector<8x64xf32>
    %29 = arith.mulf %24, %28 : vector<8x64xf32>
    %c1_i32 = arith.constant 1 : i32
    %c8_i32_13 = arith.constant 8 : i32
    %30 = arith.muli %c1_i32, %c8_i32_13 : i32
    %31 = arith.index_cast %30 : i32 to index
    %c0_14 = arith.constant 0 : index
    %32 = vector.load %arg9[%31, %c0_14] : memref<64x256xf32, #tpu.memory_space<vmem>>, vector<8x256xf32>
    %cst_15 = arith.constant dense<0.000000e+00> : vector<8x256xf32>
    %33 = tpu.matmul %29, %7, %cst_15 {dimension_numbers = #tpu.dot_dimension_numbers<[1], [0], [0], [1], [0, 0, 1, 1], [], []>} : vector<8x64xf32>, vector<64x256xf32>, vector<8x256xf32> -> vector<8x256xf32>
    %34 = arith.addf %32, %33 : vector<8x256xf32>
    %35 = vector.extract_strided_slice %34 {offsets = [0, 0], sizes = [8, 192], strides = [1, 1]} : vector<8x256xf32> to vector<8x192xf32>
    %36 = arith.negf %35 : vector<8x192xf32>
    %37 = math.exp %36 : vector<8x192xf32>
    %cst_16 = arith.constant 1.000000e+00 : f32
    %38 = vector.broadcast %cst_16 : f32 to vector<8x192xf32>
    %39 = arith.addf %38, %37 : vector<8x192xf32>
    %40 = arith.divf %38, %39 : vector<8x192xf32>
    %41 = vector.extract_strided_slice %34 {offsets = [0, 192], sizes = [8, 64], strides = [1, 1]} : vector<8x256xf32> to vector<8x64xf32>
    %42 = math.tanh %41 : vector<8x64xf32>
    %43 = vector.extract_strided_slice %40 {offsets = [0, 0], sizes = [8, 64], strides = [1, 1]} : vector<8x192xf32> to vector<8x64xf32>
    %44 = vector.extract_strided_slice %40 {offsets = [0, 64], sizes = [8, 64], strides = [1, 1]} : vector<8x192xf32> to vector<8x64xf32>
    %45 = vector.extract_strided_slice %40 {offsets = [0, 128], sizes = [8, 64], strides = [1, 1]} : vector<8x192xf32> to vector<8x64xf32>
    %46 = arith.mulf %44, %27 : vector<8x64xf32>
    %47 = arith.mulf %43, %42 : vector<8x64xf32>
    %48 = arith.addf %46, %47 : vector<8x64xf32>
    %49 = math.tanh %48 : vector<8x64xf32>
    %50 = arith.mulf %45, %49 : vector<8x64xf32>
    %c2_i32 = arith.constant 2 : i32
    %c8_i32_17 = arith.constant 8 : i32
    %51 = arith.muli %c2_i32, %c8_i32_17 : i32
    %52 = arith.index_cast %51 : i32 to index
    %c0_18 = arith.constant 0 : index
    %53 = vector.load %arg9[%52, %c0_18] : memref<64x256xf32, #tpu.memory_space<vmem>>, vector<8x256xf32>
    %cst_19 = arith.constant dense<0.000000e+00> : vector<8x256xf32>
    %54 = tpu.matmul %50, %7, %cst_19 {dimension_numbers = #tpu.dot_dimension_numbers<[1], [0], [0], [1], [0, 0, 1, 1], [], []>} : vector<8x64xf32>, vector<64x256xf32>, vector<8x256xf32> -> vector<8x256xf32>
    %55 = arith.addf %53, %54 : vector<8x256xf32>
    %56 = vector.extract_strided_slice %55 {offsets = [0, 0], sizes = [8, 192], strides = [1, 1]} : vector<8x256xf32> to vector<8x192xf32>
    %57 = arith.negf %56 : vector<8x192xf32>
    %58 = math.exp %57 : vector<8x192xf32>
    %cst_20 = arith.constant 1.000000e+00 : f32
    %59 = vector.broadcast %cst_20 : f32 to vector<8x192xf32>
    %60 = arith.addf %59, %58 : vector<8x192xf32>
    %61 = arith.divf %59, %60 : vector<8x192xf32>
    %62 = vector.extract_strided_slice %55 {offsets = [0, 192], sizes = [8, 64], strides = [1, 1]} : vector<8x256xf32> to vector<8x64xf32>
    %63 = math.tanh %62 : vector<8x64xf32>
    %64 = vector.extract_strided_slice %61 {offsets = [0, 0], sizes = [8, 64], strides = [1, 1]} : vector<8x192xf32> to vector<8x64xf32>
    %65 = vector.extract_strided_slice %61 {offsets = [0, 64], sizes = [8, 64], strides = [1, 1]} : vector<8x192xf32> to vector<8x64xf32>
    %66 = vector.extract_strided_slice %61 {offsets = [0, 128], sizes = [8, 64], strides = [1, 1]} : vector<8x192xf32> to vector<8x64xf32>
    %67 = arith.mulf %65, %48 : vector<8x64xf32>
    %68 = arith.mulf %64, %63 : vector<8x64xf32>
    %69 = arith.addf %67, %68 : vector<8x64xf32>
    %70 = math.tanh %69 : vector<8x64xf32>
    %71 = arith.mulf %66, %70 : vector<8x64xf32>
    %c3_i32 = arith.constant 3 : i32
    %c8_i32_21 = arith.constant 8 : i32
    %72 = arith.muli %c3_i32, %c8_i32_21 : i32
    %73 = arith.index_cast %72 : i32 to index
    %c0_22 = arith.constant 0 : index
    %74 = vector.load %arg9[%73, %c0_22] : memref<64x256xf32, #tpu.memory_space<vmem>>, vector<8x256xf32>
    %cst_23 = arith.constant dense<0.000000e+00> : vector<8x256xf32>
    %75 = tpu.matmul %71, %7, %cst_23 {dimension_numbers = #tpu.dot_dimension_numbers<[1], [0], [0], [1], [0, 0, 1, 1], [], []>} : vector<8x64xf32>, vector<64x256xf32>, vector<8x256xf32> -> vector<8x256xf32>
    %76 = arith.addf %74, %75 : vector<8x256xf32>
    %77 = vector.extract_strided_slice %76 {offsets = [0, 0], sizes = [8, 192], strides = [1, 1]} : vector<8x256xf32> to vector<8x192xf32>
    %78 = arith.negf %77 : vector<8x192xf32>
    %79 = math.exp %78 : vector<8x192xf32>
    %cst_24 = arith.constant 1.000000e+00 : f32
    %80 = vector.broadcast %cst_24 : f32 to vector<8x192xf32>
    %81 = arith.addf %80, %79 : vector<8x192xf32>
    %82 = arith.divf %80, %81 : vector<8x192xf32>
    %83 = vector.extract_strided_slice %76 {offsets = [0, 192], sizes = [8, 64], strides = [1, 1]} : vector<8x256xf32> to vector<8x64xf32>
    %84 = math.tanh %83 : vector<8x64xf32>
    %85 = vector.extract_strided_slice %82 {offsets = [0, 0], sizes = [8, 64], strides = [1, 1]} : vector<8x192xf32> to vector<8x64xf32>
    %86 = vector.extract_strided_slice %82 {offsets = [0, 64], sizes = [8, 64], strides = [1, 1]} : vector<8x192xf32> to vector<8x64xf32>
    %87 = vector.extract_strided_slice %82 {offsets = [0, 128], sizes = [8, 64], strides = [1, 1]} : vector<8x192xf32> to vector<8x64xf32>
    %88 = arith.mulf %86, %69 : vector<8x64xf32>
    %89 = arith.mulf %85, %84 : vector<8x64xf32>
    %90 = arith.addf %88, %89 : vector<8x64xf32>
    %91 = math.tanh %90 : vector<8x64xf32>
    %92 = arith.mulf %87, %91 : vector<8x64xf32>
    %c4_i32 = arith.constant 4 : i32
    %c8_i32_25 = arith.constant 8 : i32
    %93 = arith.muli %c4_i32, %c8_i32_25 : i32
    %94 = arith.index_cast %93 : i32 to index
    %c0_26 = arith.constant 0 : index
    %95 = vector.load %arg9[%94, %c0_26] : memref<64x256xf32, #tpu.memory_space<vmem>>, vector<8x256xf32>
    %cst_27 = arith.constant dense<0.000000e+00> : vector<8x256xf32>
    %96 = tpu.matmul %92, %7, %cst_27 {dimension_numbers = #tpu.dot_dimension_numbers<[1], [0], [0], [1], [0, 0, 1, 1], [], []>} : vector<8x64xf32>, vector<64x256xf32>, vector<8x256xf32> -> vector<8x256xf32>
    %97 = arith.addf %95, %96 : vector<8x256xf32>
    %98 = vector.extract_strided_slice %97 {offsets = [0, 0], sizes = [8, 192], strides = [1, 1]} : vector<8x256xf32> to vector<8x192xf32>
    %99 = arith.negf %98 : vector<8x192xf32>
    %100 = math.exp %99 : vector<8x192xf32>
    %cst_28 = arith.constant 1.000000e+00 : f32
    %101 = vector.broadcast %cst_28 : f32 to vector<8x192xf32>
    %102 = arith.addf %101, %100 : vector<8x192xf32>
    %103 = arith.divf %101, %102 : vector<8x192xf32>
    %104 = vector.extract_strided_slice %97 {offsets = [0, 192], sizes = [8, 64], strides = [1, 1]} : vector<8x256xf32> to vector<8x64xf32>
    %105 = math.tanh %104 : vector<8x64xf32>
    %106 = vector.extract_strided_slice %103 {offsets = [0, 0], sizes = [8, 64], strides = [1, 1]} : vector<8x192xf32> to vector<8x64xf32>
    %107 = vector.extract_strided_slice %103 {offsets = [0, 64], sizes = [8, 64], strides = [1, 1]} : vector<8x192xf32> to vector<8x64xf32>
    %108 = vector.extract_strided_slice %103 {offsets = [0, 128], sizes = [8, 64], strides = [1, 1]} : vector<8x192xf32> to vector<8x64xf32>
    %109 = arith.mulf %107, %90 : vector<8x64xf32>
    %110 = arith.mulf %106, %105 : vector<8x64xf32>
    %111 = arith.addf %109, %110 : vector<8x64xf32>
    %112 = math.tanh %111 : vector<8x64xf32>
    %113 = arith.mulf %108, %112 : vector<8x64xf32>
    %c5_i32 = arith.constant 5 : i32
    %c8_i32_29 = arith.constant 8 : i32
    %114 = arith.muli %c5_i32, %c8_i32_29 : i32
    %115 = arith.index_cast %114 : i32 to index
    %c0_30 = arith.constant 0 : index
    %116 = vector.load %arg9[%115, %c0_30] : memref<64x256xf32, #tpu.memory_space<vmem>>, vector<8x256xf32>
    %cst_31 = arith.constant dense<0.000000e+00> : vector<8x256xf32>
    %117 = tpu.matmul %113, %7, %cst_31 {dimension_numbers = #tpu.dot_dimension_numbers<[1], [0], [0], [1], [0, 0, 1, 1], [], []>} : vector<8x64xf32>, vector<64x256xf32>, vector<8x256xf32> -> vector<8x256xf32>
    %118 = arith.addf %116, %117 : vector<8x256xf32>
    %119 = vector.extract_strided_slice %118 {offsets = [0, 0], sizes = [8, 192], strides = [1, 1]} : vector<8x256xf32> to vector<8x192xf32>
    %120 = arith.negf %119 : vector<8x192xf32>
    %121 = math.exp %120 : vector<8x192xf32>
    %cst_32 = arith.constant 1.000000e+00 : f32
    %122 = vector.broadcast %cst_32 : f32 to vector<8x192xf32>
    %123 = arith.addf %122, %121 : vector<8x192xf32>
    %124 = arith.divf %122, %123 : vector<8x192xf32>
    %125 = vector.extract_strided_slice %118 {offsets = [0, 192], sizes = [8, 64], strides = [1, 1]} : vector<8x256xf32> to vector<8x64xf32>
    %126 = math.tanh %125 : vector<8x64xf32>
    %127 = vector.extract_strided_slice %124 {offsets = [0, 0], sizes = [8, 64], strides = [1, 1]} : vector<8x192xf32> to vector<8x64xf32>
    %128 = vector.extract_strided_slice %124 {offsets = [0, 64], sizes = [8, 64], strides = [1, 1]} : vector<8x192xf32> to vector<8x64xf32>
    %129 = vector.extract_strided_slice %124 {offsets = [0, 128], sizes = [8, 64], strides = [1, 1]} : vector<8x192xf32> to vector<8x64xf32>
    %130 = arith.mulf %128, %111 : vector<8x64xf32>
    %131 = arith.mulf %127, %126 : vector<8x64xf32>
    %132 = arith.addf %130, %131 : vector<8x64xf32>
    %133 = math.tanh %132 : vector<8x64xf32>
    %134 = arith.mulf %129, %133 : vector<8x64xf32>
    %c6_i32 = arith.constant 6 : i32
    %c8_i32_33 = arith.constant 8 : i32
    %135 = arith.muli %c6_i32, %c8_i32_33 : i32
    %136 = arith.index_cast %135 : i32 to index
    %c0_34 = arith.constant 0 : index
    %137 = vector.load %arg9[%136, %c0_34] : memref<64x256xf32, #tpu.memory_space<vmem>>, vector<8x256xf32>
    %cst_35 = arith.constant dense<0.000000e+00> : vector<8x256xf32>
    %138 = tpu.matmul %134, %7, %cst_35 {dimension_numbers = #tpu.dot_dimension_numbers<[1], [0], [0], [1], [0, 0, 1, 1], [], []>} : vector<8x64xf32>, vector<64x256xf32>, vector<8x256xf32> -> vector<8x256xf32>
    %139 = arith.addf %137, %138 : vector<8x256xf32>
    %140 = vector.extract_strided_slice %139 {offsets = [0, 0], sizes = [8, 192], strides = [1, 1]} : vector<8x256xf32> to vector<8x192xf32>
    %141 = arith.negf %140 : vector<8x192xf32>
    %142 = math.exp %141 : vector<8x192xf32>
    %cst_36 = arith.constant 1.000000e+00 : f32
    %143 = vector.broadcast %cst_36 : f32 to vector<8x192xf32>
    %144 = arith.addf %143, %142 : vector<8x192xf32>
    %145 = arith.divf %143, %144 : vector<8x192xf32>
    %146 = vector.extract_strided_slice %139 {offsets = [0, 192], sizes = [8, 64], strides = [1, 1]} : vector<8x256xf32> to vector<8x64xf32>
    %147 = math.tanh %146 : vector<8x64xf32>
    %148 = vector.extract_strided_slice %145 {offsets = [0, 0], sizes = [8, 64], strides = [1, 1]} : vector<8x192xf32> to vector<8x64xf32>
    %149 = vector.extract_strided_slice %145 {offsets = [0, 64], sizes = [8, 64], strides = [1, 1]} : vector<8x192xf32> to vector<8x64xf32>
    %150 = vector.extract_strided_slice %145 {offsets = [0, 128], sizes = [8, 64], strides = [1, 1]} : vector<8x192xf32> to vector<8x64xf32>
    %151 = arith.mulf %149, %132 : vector<8x64xf32>
    %152 = arith.mulf %148, %147 : vector<8x64xf32>
    %153 = arith.addf %151, %152 : vector<8x64xf32>
    %154 = math.tanh %153 : vector<8x64xf32>
    %155 = arith.mulf %150, %154 : vector<8x64xf32>
    %c7_i32 = arith.constant 7 : i32
    %c8_i32_37 = arith.constant 8 : i32
    %156 = arith.muli %c7_i32, %c8_i32_37 : i32
    %157 = arith.index_cast %156 : i32 to index
    %c0_38 = arith.constant 0 : index
    %158 = vector.load %arg9[%157, %c0_38] : memref<64x256xf32, #tpu.memory_space<vmem>>, vector<8x256xf32>
    %cst_39 = arith.constant dense<0.000000e+00> : vector<8x256xf32>
    %159 = tpu.matmul %155, %7, %cst_39 {dimension_numbers = #tpu.dot_dimension_numbers<[1], [0], [0], [1], [0, 0, 1, 1], [], []>} : vector<8x64xf32>, vector<64x256xf32>, vector<8x256xf32> -> vector<8x256xf32>
    %160 = arith.addf %158, %159 : vector<8x256xf32>
    %161 = vector.extract_strided_slice %160 {offsets = [0, 0], sizes = [8, 192], strides = [1, 1]} : vector<8x256xf32> to vector<8x192xf32>
    %162 = arith.negf %161 : vector<8x192xf32>
    %163 = math.exp %162 : vector<8x192xf32>
    %cst_40 = arith.constant 1.000000e+00 : f32
    %164 = vector.broadcast %cst_40 : f32 to vector<8x192xf32>
    %165 = arith.addf %164, %163 : vector<8x192xf32>
    %166 = arith.divf %164, %165 : vector<8x192xf32>
    %167 = vector.extract_strided_slice %160 {offsets = [0, 192], sizes = [8, 64], strides = [1, 1]} : vector<8x256xf32> to vector<8x64xf32>
    %168 = math.tanh %167 : vector<8x64xf32>
    %169 = vector.extract_strided_slice %166 {offsets = [0, 0], sizes = [8, 64], strides = [1, 1]} : vector<8x192xf32> to vector<8x64xf32>
    %170 = vector.extract_strided_slice %166 {offsets = [0, 64], sizes = [8, 64], strides = [1, 1]} : vector<8x192xf32> to vector<8x64xf32>
    %171 = vector.extract_strided_slice %166 {offsets = [0, 128], sizes = [8, 64], strides = [1, 1]} : vector<8x192xf32> to vector<8x64xf32>
    %172 = arith.mulf %170, %153 : vector<8x64xf32>
    %173 = arith.mulf %169, %168 : vector<8x64xf32>
    %174 = arith.addf %172, %173 : vector<8x64xf32>
    %175 = math.tanh %174 : vector<8x64xf32>
    %176 = arith.mulf %171, %175 : vector<8x64xf32>
    %c8_i32_41 = arith.constant 8 : i32
    %c0_42 = arith.constant 0 : index
    %c0_43 = arith.constant 0 : index
    %177 = vector.load %arg4[%c0_42, %c0_43] : memref<64x32xf32, #tpu.memory_space<vmem>>, vector<64x32xf32>
    %cst_44 = arith.constant dense<0.000000e+00> : vector<8x32xf32>
    %178 = tpu.matmul %176, %177, %cst_44 {dimension_numbers = #tpu.dot_dimension_numbers<[1], [0], [0], [1], [0, 0, 1, 1], [], []>} : vector<8x64xf32>, vector<64x32xf32>, vector<8x32xf32> -> vector<8x32xf32>
    %c0_45 = arith.constant 0 : index
    %c0_46 = arith.constant 0 : index
    %179 = vector.load %arg5[%c0_45, %c0_46] : memref<1x32xf32, #tpu.memory_space<vmem>>, vector<1x32xf32>
    %180 = vector.broadcast %179 : vector<1x32xf32> to vector<8x32xf32>
    %181 = arith.addf %178, %180 : vector<8x32xf32>
    %cst_47 = arith.constant 0.000000e+00 : f32
    %182 = vector.broadcast %cst_47 : f32 to vector<8x32xf32>
    %183 = arith.maximumf %181, %182 : vector<8x32xf32>
    %c0_48 = arith.constant 0 : index
    %c0_49 = arith.constant 0 : index
    %184 = vector.load %arg6[%c0_48, %c0_49] : memref<1x32xf32, #tpu.memory_space<vmem>>, vector<1x32xf32>
    %185 = vector.broadcast %184 : vector<1x32xf32> to vector<8x32xf32>
    %186 = arith.mulf %183, %185 : vector<8x32xf32>
    %cst_50 = arith.constant dense<0.000000e+00> : vector<8xf32>
    %187 = vector.multi_reduction <add>, %186, %cst_50 [1] : vector<8x32xf32> to vector<8xf32>
    %188 = vector.shape_cast %187 : vector<8xf32> to vector<8x1xf32>
    %c0_51 = arith.constant 0 : index
    %c0_52 = arith.constant 0 : index
    %189 = vector.load %arg7[%c0_51, %c0_52] : memref<1x1xf32, #tpu.memory_space<vmem>>, vector<1x1xf32>
    %190 = vector.broadcast %189 : vector<1x1xf32> to vector<8x1xf32>
    %191 = arith.addf %188, %190 : vector<8x1xf32>
    %c0_53 = arith.constant 0 : index
    %c0_54 = arith.constant 0 : index
    %192 = vector.load %arg8[%c0_53, %c0_54] : memref<8x1xf32, #tpu.memory_space<vmem>>, vector<8x1xf32>
    tpu.vector_store %arg8[%c0_53, %c0_54], %191 {strides = array<i32>} : memref<8x1xf32, #tpu.memory_space<vmem>>, vector<8x1xf32>,
    return
  }
}

</mosaic_0001>

<bundles_post_ra>
// kernel: model_forward.1
= control target key start
LH: loop header
LB: loop body
LE: loop exit
PB: predicated region body
PF: predicated region fallthrough
CT: control target
= control target key end

     0   :  { %v1551_v3 = vmov 0.0   ;;  %vm59_vm0 = vcmask 261120   ;;  %v49_v49 = vlaneseq  ;;  %s1552_s23 = smov 64   ;;  %vm231_vm1 = vcmask 523264   ;;  %s1924_s1 = inlined_call_operand.vmem [shape: f32[32,256], index: 1, kind: input, shape index: {}]   ;;  %s1925_s3 = inlined_call_operand.vmem [shape: f32[64,256], index: 3, kind: input, shape index: {}]   ;;  %s1926_s0 = inlined_call_operand.vmem [shape: f32[64,32], index: 0, kind: input, shape index: {}]   ;;  %s1927_s2 = inlined_call_operand.vmem [shape: f32[1,256], index: 2, kind: input, shape index: {}]   ;;  %s1928_s4 = inlined_call_operand.vmem [shape: f32[64,32], index: 4, kind: input, shape index: {}]   ;;  %s1929_s7 = inlined_call_operand.<no memory space> [shape: f32[1,1], index: 7, kind: input, shape index: {}]   ;;  %s1930_s5 = inlined_call_operand.vmem [shape: f32[1,32], index: 5, kind: input, shape index: {}]   ;;  %s1931_s6 = inlined_call_operand.vmem [shape: f32[1,32], index: 6, kind: input, shape index: {}]   ;;  %s1932_s8 = inlined_call_operand.vmem [shape: f32[8,1], index: 8, kind: output, shape index: {}]  }
   0x1   :  { %v40_v0 = vld [vmem:[%s1924_s1 + $0x8] sm:$0xff]  ;;  %v42_v1 = vld [vmem:[%s1924_s1 + $0x18] sm:$0xff]  ;;  %v39_v2 = vld [vmem:[%s1924_s1] sm:$0xff]  ;;  %148 = vmatprep.mubr.f32.mxu1 %v1551_v3  ;;  %623 = vmatprep.mubr.f32.mxu0 %v1551_v3  ;;  %vm1554_vm2 = vmmov 0   ;;  %vm1202_vm3 = vcmask 7168  }
   0x2   :  { %v1271_v4 = vpack.c.bf16 %v42_v1, %v40_v0  ;;  %v41_v5 = vld [vmem:[%s1924_s1 + $0x10] sm:$0xff]  ;;  %v44_v6 = vld [vmem:[%s1924_s1 + $0x28] sm:$0xff]  ;;  %v46_v7 = vld [vmem:[%s1924_s1 + $0x38] sm:$0xff]  ;;  %v50_v52 = vshrl.u32 %v49_v49, 7 }
   0x3   :  { %v1273_v8 = vpack.c.bf16 %v41_v5, %v39_v2  ;;  %v1275_v9 = vpack.c.bf16 %v46_v7, %v44_v6  ;;  %v43_v10 = vld [vmem:[%s1924_s1 + $0x20] sm:$0xff]  ;;  %v45_v11 = vld [vmem:[%s1924_s1 + $0x30] sm:$0xff]  ;;  %v214_v12 = vld [vmem:[%s1925_s3 + $0x8] sm:$0xff] }
   0x4   :  { %1272 = vmatprep.subr.bf16.mxu1 %v1271_v4  ;;  %v216_v13 = vld [vmem:[%s1925_s3 + $0x18] sm:$0xff]  ;;  %v213_v14 = vld [vmem:[%s1925_s3] sm:$0xff]  ;;  %v1277_v15 = vpack.c.bf16 %v45_v11, %v43_v10  ;;  %v215_v17 = vld [vmem:[%s1925_s3 + $0x10] sm:$0xff]  ;;  %v55_v55 = vsub.s32 1, %v50_v52  ;;  %v51_v0 = vsub.s32 0, %v50_v52 }
   0x5   :  { %1274 = vmatpush1.bf16.msra.mxu1 %v1273_v8  ;;  %v1635_v16 = vpack.c.bf16 %v216_v13, %v214_v12  ;;  %v1640_v18 = vpack.c.bf16 %v215_v17, %v213_v14  ;;  %v218_v19 = vld [vmem:[%s1925_s3 + $0x28] sm:$0xff]  ;;  %v220_v20 = vld [vmem:[%s1925_s3 + $0x38] sm:$0xff]  ;;  %v217_v22 = vld [vmem:[%s1925_s3 + $0x20] sm:$0xff] }
   0x6   :  { %1276 = vmatprep.subr.bf16.mxu1 %v1275_v9  ;;  %v1648_v21 = vpack.c.bf16 %v220_v20, %v218_v19  ;;  %v219_v23 = vld [vmem:[%s1925_s3 + $0x30] sm:$0xff]  ;;  %v31_v24 = vld [vmem:[%s1926_s0] sm:$0xff]  ;;  %v222_v25 = vld [vmem:[%s1925_s3 + $0x48] sm:$0xff] }
   0x7   :  { %1328 = vmatprep.subr.bf16.mxu0 %v1635_v16  ;;  %v224_v26 = vld [vmem:[%s1925_s3 + $0x58] sm:$0xff]  ;;  %v1669_v27 = vpack.c.bf16 %v219_v23, %v217_v22  ;;  %v221_v28 = vld [vmem:[%s1925_s3 + $0x40] sm:$0xff]  ;;  %v223_v29 = vld [vmem:[%s1925_s3 + $0x50] sm:$0xff] }
   0x8   :  { %1330 = vmatpush1.bf16.msra.mxu0 %v1640_v18  ;;  %v1678_v30 = vpack.c.bf16 %v224_v26, %v222_v25  ;;  %v32_v31 = vld [vmem:[%s1926_s0 + $0x8] sm:$0xff]  ;;  %v228_v33 = vld [vmem:[%s1925_s3 + $0x78] sm:$0xff]  ;;  %v1693_v34 = vpack.c.bf16 %v223_v29, %v221_v28  ;;  %v225_v35 = vld [vmem:[%s1925_s3 + $0x60] sm:$0xff] }
   0x9   :  { %1278 = vmatpush1.bf16.msra.mxu1 %v1277_v15  ;;  %1332 = vmatprep.subr.bf16.mxu0 %v1648_v21  ;;  %v226_v32 = vld [vmem:[%s1925_s3 + $0x68] sm:$0xff]  ;;  %v227_v36 = vld [vmem:[%s1925_s3 + $0x70] sm:$0xff]  ;;  %v34_v40 = vld [vmem:[%s1926_s0 + $0x18] sm:$0xff] }
   0xa   :  { %1280 = vmatprep.subr.bf16.mxu1 %v1635_v16  ;;  %v1703_v37 = vpack.c.bf16 %v228_v33, %v226_v32  ;;  %v33_v38 = vld [vmem:[%s1926_s0 + $0x10] sm:$0xff]  ;;  %v1712_v39 = vpack.c.bf16 %v227_v36, %v225_v35  ;;  %v35_v41 = vld [vmem:[%s1926_s0 + $0x20] sm:$0xff]  ;;  %v36_v42 = vld [vmem:[%s1926_s0 + $0x28] sm:$0xff] }
   0xb   :  { %v37_v43 = vld [vmem:[%s1926_s0 + $0x30] sm:$0xff]  ;;  %v38_v44 = vld [vmem:[%s1926_s0 + $0x38] sm:$0xff]  ;;  %v47_v57 = vld [vmem:[%s1927_s2] sm:$0x3] }
   0xc   :  { %1208 = vmatmul.mubr.msk.f32.vlgmr.msra.gmra.mrb[0].mxu1 %vm59_vm0, %v31_v24  ;;  %1334 = vmatpush1.bf16.msra.mxu0 %v1669_v27  ;;  %v1781_v59 = vrot.slane %v47_v57, %v55_v55  ;;  %v1785_v1 = vrot.slane %v47_v57, %v51_v0 }
   0xd   :  { %1282 = vmatpush1.bf16.msra.mxu1 %v1640_v18  ;;  %154 = vmatprep.mubr.f32.mxu1 %v1551_v3 }
   0xe   :  { %1284 = vmatprep.subr.bf16.mxu1 %v1648_v21  ;;  %1336 = vmatprep.subr.bf16.mxu0 %v1678_v30 }
  0x10   :  { %1209 = vmatmul.mubr.msk.f32.gmra.mrb[2].mxu1 %vm59_vm0, %v32_v31  ;;  %1338 = vmatpush1.bf16.msra.mxu0 %v1693_v34 }
  0x11   :  { %160 = vmatprep.mubr.f32.mxu1 %v1551_v3  ;;  %1286 = vmatpush1.bf16.msra.mxu1 %v1669_v27 }
  0x12   :  { %1288 = vmatprep.subr.bf16.mxu1 %v1678_v30  ;;  %1340 = vmatprep.subr.bf16.mxu0 %v1703_v37 }
  0x14   :  { %1210 = vmatmul.mubr.msk.f32.gmra.mrb[4].mxu1 %vm59_vm0, %v33_v38  ;;  %1342 = vmatpush1.bf16.msra.mxu0 %v1712_v39 }
  0x15   :  { %166 = vmatprep.mubr.f32.mxu1 %v1551_v3  ;;  %1290 = vmatpush1.bf16.msra.mxu1 %v1693_v34 }
  0x16   :  { %1292 = vmatprep.subr.bf16.mxu1 %v1703_v37  ;;  %1344 = vmatprep.subr.bf16.mxu0 %v1635_v16 }
  0x18   :  { %1211 = vmatmul.mubr.msk.f32.gmra.mrb[6].mxu1 %vm59_vm0, %v34_v40 }
  0x19   :  { %172 = vmatprep.mubr.f32.mxu1 %v1551_v3  ;;  %1294 = vmatpush1.bf16.msra.mxu1 %v1712_v39 }
  0x1a   :  { %1296 = vmatprep.subr.bf16.mxu1 %v1635_v16 }
  0x1c   :  { %1212 = vmatmul.mubr.msk.f32.gmra.mrb[8].mxu1 %vm59_vm0, %v35_v41 }
  0x1d   :  { %178 = vmatprep.mubr.f32.mxu1 %v1551_v3 }
  0x20   :  { %1213 = vmatmul.mubr.msk.f32.gmra.mrb[10].mxu1 %vm59_vm0, %v36_v42 }
  0x21   :  { %184 = vmatprep.mubr.f32.mxu1 %v1551_v3 }
  0x24   :  { %1214 = vmatmul.mubr.msk.f32.gmra.mrb[12].mxu1 %vm59_vm0, %v37_v43 }
  0x25   :  { %190 = vmatprep.mubr.f32.mxu1 %v1551_v3 }
  0x28   :  { %1215 = vmatmul.mubr.msk.f32.gmra.mrb[14].mxu1 %vm59_vm0, %v38_v44 }
  0x29   :  { %299 = vmatprep.mubr.f32.mxu1 %v1551_v3 }
  0x2c   :  { %300 = vmatmul.mubr.f32.vlgmr.msra.gmra.mrb[0].mxu1 %v1551_v3 }
  0x2d   :  { %1298 = vmatpush1.bf16.msra.mxu1 %v1640_v18  ;;  %407 = vmatprep.mubr.f32.mxu1 %v1551_v3 }
  0x2e   :  { %1300 = vmatprep.subr.bf16.mxu1 %v1648_v21 }
  0x31   :  { %1302 = vmatpush1.bf16.msra.mxu1 %v1669_v27 }
  0x32   :  { %1304 = vmatprep.subr.bf16.mxu1 %v1678_v30 }
  0x35   :  { %1306 = vmatpush1.bf16.msra.mxu1 %v1693_v34 }
  0x36   :  { %1308 = vmatprep.subr.bf16.mxu1 %v1703_v37 }
  0x39   :  { %1310 = vmatpush1.bf16.msra.mxu1 %v1712_v39 }
  0x3a   :  { %1312 = vmatprep.subr.bf16.mxu1 %v1635_v16 }
  0xeb   :  { %v1758_v45 = vpop.f32.mrb[6].mxu1 }
  0xec   :  { %v1760_v46 = vpop.f32.mrb[7].mxu1 }
  0xef   :  { %v1762_v47 = vpop.f32.mrb[8].mxu1 }
  0xf0   :  { %v1764_v48 = vpop.f32.mrb[9].mxu1 }
  0xf3   :  { %v1766_v50 = vpop.f32.mrb[10].mxu1 }
  0xf4   :  { %v1768_v51 = vpop.f32.mrb[11].mxu1 }
  0xf7   :  { %v1770_v53 = vpop.f32.mrb[12].mxu1 }
  0xf8   :  { %v1772_v54 = vpop.f32.mrb[13].mxu1 }
  0xfb   :  { %v1774_v56 = vpop.f32.mrb[14].mxu1 }
  0xfc   :  { %v1779_v58 = vpop.f32.mrb[15].mxu1 }
  0xff   :  { %v301_v60 = vpop.f32.mrb[0].mxu1 }
 0x100   :  { %v303_v61 = vpop.f32.mrb[1].mxu1  ;;  %v1419_v2 = vadd.f32 %v301_v60, %v1785_v1 }
 0x101   :  { %v1420_v62 = vadd.f32 %v303_v61, %v1781_v59 }
 0x102   :  { %v1216_v4 = vmul.f32 -1.442695, %v1419_v2 }
 0x103   :  { %1455 = vtanh.f32 %v1420_v62  ;;  %v1217_v14 = vmul.f32 -1.442695, %v1420_v62 }
 0x104   :  { %1457 = vpow2.f32 %v1216_v4 }
 0x10d   :  { %v1456_v63 = vpop.eup %1455 }
 0x10e   :  { %323 = vrot.lane.b32.xlu0 %v1456_v63, %s1552_s23  ;;  %v1458_v5 = vpop.eup %1457 }
 0x10f   :  { %v314_v6 = vadd.f32 1.0, %v1458_v5 }
 0x111   :  { %1459 = vrcp.f32 %v314_v6 }
 0x11b   :  { %v1460_v7 = vpop.eup %1459 }
 0x11c   :  { %v321_v10 = vmul.f32 0.0, %v1460_v7 }
 0x180   :  { %v324_v8 = vpop.permute.xlu0 %323 }
 0x181   :  { %v326_v9 = vmul.f32 %v1460_v7, %v324_v8 }
 0x183   :  { %328 = vrot.lane.b32.xlu0 %v326_v9, %s1552_s23 }
 0x1f5   :  { %v329_v11 = vpop.permute.xlu0 %328 }
 0x1f6   :  { %v331_v12 = vadd.f32 %v329_v11, %v321_v10 }
 0x1f8   :  { %1461 = vtanh.f32 %v331_v12 }
 0x1f9   :  { %1463 = vpow2.f32 %v1217_v14 }
 0x202   :  { %v1462_v13 = vpop.eup %1461 }
 0x203   :  { %334 = vrot.lane.b32.xlu1 %v1462_v13, %s1552_s23  ;;  %v1464_v15 = vpop.eup %1463 }
 0x204   :  { %v315_v17 = vadd.f32 1.0, %v1464_v15 }
 0x206   :  { %1465 = vrcp.f32 %v315_v17 }
 0x210   :  { %v1466_v19 = vpop.eup %1465 }
 0x275   :  { %v335_v20 = vpop.permute.xlu1 %334 }
 0x276   :  { %v337_v22 = vmul.f32 %v1466_v19, %v335_v20 }
 0x278   :  { %1218 = vmatmul.mubr.msk.f32.vlgmr.msra.gmra.mrb[2].mxu1 %vm231_vm1, %v337_v22  ;;  %v169_v22 = vadd.f32 %v1758_v45, %v1785_v1 }
 0x279   :  { %1314 = vmatpush1.bf16.msra.mxu1 %v1640_v18  ;;  %515 = vmatprep.mubr.f32.mxu1 %v1551_v3 }
 0x27a   :  { %1316 = vmatprep.subr.bf16.mxu1 %v1648_v21 }
 0x27d   :  { %1318 = vmatpush1.bf16.msra.mxu1 %v1669_v27 }
 0x27e   :  { %1320 = vmatprep.subr.bf16.mxu1 %v1678_v30 }
 0x281   :  { %1322 = vmatpush1.bf16.msra.mxu1 %v1693_v34 }
 0x282   :  { %1324 = vmatprep.subr.bf16.mxu1 %v1703_v37 }
 0x285   :  { %1326 = vmatpush1.bf16.msra.mxu1 %v1712_v39 }
 0x34b   :  { %v409_v23 = vpop.f32.mrb[2].mxu1 }
 0x34c   :  { %v411_v24 = vpop.f32.mrb[3].mxu1  ;;  %v1421_v28 = vadd.f32 %v409_v23, %v1785_v1  ;;  %v171_v23 = vadd.f32 %v1760_v46, %v1781_v59 }
 0x34d   :  { %v1422_v25 = vadd.f32 %v411_v24, %v1781_v59 }
 0x34e   :  { %v1219_v29 = vmul.f32 -1.442695, %v1421_v28 }
 0x34f   :  { %1467 = vtanh.f32 %v1422_v25  ;;  %v1220_v43 = vmul.f32 -1.442695, %v1422_v25 }
 0x350   :  { %1469 = vpow2.f32 %v1219_v29 }
 0x359   :  { %v1468_v26 = vpop.eup %1467 }
 0x35a   :  { %431 = vrot.lane.b32.xlu1 %v1468_v26, %s1552_s23  ;;  %v1470_v31 = vpop.eup %1469 }
 0x35b   :  { %v422_v32 = vadd.f32 1.0, %v1470_v31 }
 0x35d   :  { %1471 = vrcp.f32 %v422_v32 }
 0x367   :  { %v1472_v33 = vpop.eup %1471 }
 0x368   :  { %v429_v38 = vmul.f32 %v1472_v33, %v331_v12 }
 0x3cc   :  { %v432_v35 = vpop.permute.xlu1 %431 }
 0x3cd   :  { %v434_v36 = vmul.f32 %v1472_v33, %v432_v35 }
 0x3cf   :  { %436 = vrot.lane.b32.xlu0 %v434_v36, %s1552_s23 }
 0x441   :  { %v437_v40 = vpop.permute.xlu0 %436 }
 0x442   :  { %v439_v41 = vadd.f32 %v437_v40, %v429_v38 }
 0x444   :  { %1473 = vtanh.f32 %v439_v41 }
 0x445   :  { %1475 = vpow2.f32 %v1220_v43 }
 0x44e   :  { %v1474_v42 = vpop.eup %1473 }
 0x44f   :  { %442 = vrot.lane.b32.xlu1 %v1474_v42, %s1552_s23  ;;  %v1476_v44 = vpop.eup %1475 }
 0x450   :  { %v423_v49 = vadd.f32 1.0, %v1476_v44 }
 0x452   :  { %1477 = vrcp.f32 %v423_v49 }
 0x45c   :  { %v1478_v52 = vpop.eup %1477 }
 0x4c1   :  { %v443_v55 = vpop.permute.xlu1 %442 }
 0x4c2   :  { %v445_v57 = vmul.f32 %v1478_v52, %v443_v55 }
 0x4c4   :  { %1221 = vmatmul.mubr.msk.f32.vlgmr.msra.gmra.mrb[4].mxu1 %vm231_vm1, %v445_v57  ;;  %v175_v57 = vadd.f32 %v1762_v47, %v1785_v1 }
 0x4c5   :  { %1268 = vmatprep.mubr.msk.f32.mxu1 %vm1554_vm2, %v1551_v3 }
 0x597   :  { %v517_v60 = vpop.f32.mrb[4].mxu1 }
 0x598   :  { %v519_v61 = vpop.f32.mrb[5].mxu1  ;;  %v1423_v0 = vadd.f32 %v517_v60, %v1785_v1  ;;  %v177_v60 = vadd.f32 %v1764_v48, %v1781_v59 }
 0x599   :  { %v1424_v62 = vadd.f32 %v519_v61, %v1781_v59 }
 0x59a   :  { %v1222_v2 = vmul.f32 -1.442695, %v1423_v0 }
 0x59b   :  { %1479 = vtanh.f32 %v1424_v62  ;;  %v1223_v13 = vmul.f32 -1.442695, %v1424_v62 }
 0x59c   :  { %1481 = vpow2.f32 %v1222_v2 }
 0x5a5   :  { %v1480_v63 = vpop.eup %1479 }
 0x5a6   :  { %539 = vrot.lane.b32.xlu0 %v1480_v63, %s1552_s23  ;;  %v1482_v4 = vpop.eup %1481 }
 0x5a7   :  { %v530_v5 = vadd.f32 1.0, %v1482_v4 }
 0x5a9   :  { %1483 = vrcp.f32 %v530_v5 }
 0x5b3   :  { %v1484_v6 = vpop.eup %1483 }
 0x5b4   :  { %v537_v9 = vmul.f32 %v1484_v6, %v439_v41 }
 0x618   :  { %v540_v7 = vpop.permute.xlu0 %539 }
 0x619   :  { %v542_v8 = vmul.f32 %v1484_v6, %v540_v7 }
 0x61b   :  { %544 = vrot.lane.b32.xlu1 %v542_v8, %s1552_s23 }
 0x68d   :  { %v545_v10 = vpop.permute.xlu1 %544 }
 0x68e   :  { %v547_v11 = vadd.f32 %v545_v10, %v537_v9 }
 0x690   :  { %1485 = vtanh.f32 %v547_v11 }
 0x691   :  { %1487 = vpow2.f32 %v1223_v13 }
 0x69a   :  { %v1486_v12 = vpop.eup %1485 }
 0x69b   :  { %550 = vrot.lane.b32.xlu0 %v1486_v12, %s1552_s23  ;;  %v1488_v14 = vpop.eup %1487 }
 0x69c   :  { %v531_v15 = vadd.f32 1.0, %v1488_v14 }
 0x69e   :  { %1489 = vrcp.f32 %v531_v15 }
 0x6a8   :  { %v1490_v17 = vpop.eup %1489 }
 0x70d   :  { %v551_v19 = vpop.permute.xlu0 %550 }
 0x70e   :  { %v553_v20 = vmul.f32 %v1490_v17, %v551_v19 }
 0x710   :  { %1224 = vmatmul.mubr.msk.f32.vlgmr.msra.gmra.mrb[0].mxu0 %vm231_vm1, %v553_v20  ;;  %v181_v20 = vadd.f32 %v1766_v50, %v1785_v1 }
 0x711   :  { %1346 = vmatpush1.bf16.msra.mxu0 %v1640_v18  ;;  %731 = vmatprep.mubr.f32.mxu0 %v1551_v3 }
 0x712   :  { %1348 = vmatprep.subr.bf16.mxu0 %v1648_v21 }
 0x715   :  { %1350 = vmatpush1.bf16.msra.mxu0 %v1669_v27 }
 0x716   :  { %1352 = vmatprep.subr.bf16.mxu0 %v1678_v30 }
 0x719   :  { %1354 = vmatpush1.bf16.msra.mxu0 %v1693_v34 }
 0x71a   :  { %1356 = vmatprep.subr.bf16.mxu0 %v1703_v37 }
 0x71d   :  { %1358 = vmatpush1.bf16.msra.mxu0 %v1712_v39 }
 0x71e   :  { %1360 = vmatprep.subr.bf16.mxu0 %v1635_v16 }
 0x7e3   :  { %v625_v24 = vpop.f32.mrb[0].mxu0 }
 0x7e4   :  { %v630_v25 = vadd.f32 %v625_v24, %v169_v22  ;;  %v627_v26 = vpop.f32.mrb[1].mxu0  ;;  %v183_v22 = vadd.f32 %v1768_v51, %v1781_v59 }
 0x7e5   :  { %v631_v28 = vadd.f32 %v627_v26, %v171_v23 }
 0x7e6   :  { %v1225_v31 = vmul.f32 -1.442695, %v630_v25 }
 0x7e7   :  { %1491 = vtanh.f32 %v631_v28  ;;  %v1226_v42 = vmul.f32 -1.442695, %v631_v28 }
 0x7e8   :  { %1493 = vpow2.f32 %v1225_v31 }
 0x7f1   :  { %v1492_v29 = vpop.eup %1491 }
 0x7f2   :  { %647 = vrot.lane.b32.xlu1 %v1492_v29, %s1552_s23  ;;  %v1494_v32 = vpop.eup %1493 }
 0x7f3   :  { %v638_v33 = vadd.f32 1.0, %v1494_v32 }
 0x7f5   :  { %1495 = vrcp.f32 %v638_v33 }
 0x7ff   :  { %v1496_v35 = vpop.eup %1495 }
 0x800   :  { %v645_v45 = vmul.f32 %v1496_v35, %v547_v11 }
 0x864   :  { %v648_v36 = vpop.permute.xlu1 %647 }
 0x865   :  { %v650_v38 = vmul.f32 %v1496_v35, %v648_v36 }
 0x867   :  { %652 = vrot.lane.b32.xlu0 %v650_v38, %s1552_s23 }
 0x8d9   :  { %v653_v46 = vpop.permute.xlu0 %652 }
 0x8da   :  { %v655_v40 = vadd.f32 %v653_v46, %v645_v45 }
 0x8dc   :  { %1497 = vtanh.f32 %v655_v40 }
 0x8dd   :  { %1499 = vpow2.f32 %v1226_v42 }
 0x8e6   :  { %v1498_v41 = vpop.eup %1497 }
 0x8e7   :  { %658 = vrot.lane.b32.xlu1 %v1498_v41, %s1552_s23  ;;  %v1500_v43 = vpop.eup %1499 }
 0x8e8   :  { %v639_v44 = vadd.f32 1.0, %v1500_v43 }
 0x8ea   :  { %1501 = vrcp.f32 %v639_v44  ;;  %v187_v44 = vadd.f32 %v1770_v53, %v1785_v1 }
 0x8f4   :  { %v1502_v49 = vpop.eup %1501 }
 0x959   :  { %v659_v52 = vpop.permute.xlu1 %658 }
 0x95a   :  { %v661_v55 = vmul.f32 %v1502_v49, %v659_v52 }
 0x95c   :  { %1227 = vmatmul.mubr.msk.f32.vlgmr.msra.gmra.mrb[2].mxu0 %vm231_vm1, %v661_v55 }
 0x95d   :  { %1362 = vmatpush1.bf16.msra.mxu0 %v1640_v18  ;;  %839 = vmatprep.mubr.f32.mxu0 %v1551_v3 }
 0x95e   :  { %1364 = vmatprep.subr.bf16.mxu0 %v1648_v21 }
 0x961   :  { %1366 = vmatpush1.bf16.msra.mxu0 %v1669_v27 }
 0x962   :  { %1368 = vmatprep.subr.bf16.mxu0 %v1678_v30 }
 0x965   :  { %1370 = vmatpush1.bf16.msra.mxu0 %v1693_v34 }
 0x966   :  { %1372 = vmatprep.subr.bf16.mxu0 %v1703_v37 }
 0x969   :  { %1374 = vmatpush1.bf16.msra.mxu0 %v1712_v39 }
 0x96a   :  { %1376 = vmatprep.subr.bf16.mxu0 %v1635_v16 }
 0xa2f   :  { %v733_v61 = vpop.f32.mrb[2].mxu0 }
 0xa30   :  { %v738_v62 = vadd.f32 %v733_v61, %v175_v57  ;;  %v735_v63 = vpop.f32.mrb[3].mxu0 }
 0xa31   :  { %v739_v0 = vadd.f32 %v735_v63, %v177_v60 }
 0xa32   :  { %v1228_v4 = vmul.f32 -1.442695, %v738_v62 }
 0xa33   :  { %1503 = vtanh.f32 %v739_v0  ;;  %v1229_v12 = vmul.f32 -1.442695, %v739_v0 }
 0xa34   :  { %1505 = vpow2.f32 %v1228_v4 }
 0xa3d   :  { %v1504_v2 = vpop.eup %1503 }
 0xa3e   :  { %755 = vrot.lane.b32.xlu0 %v1504_v2, %s1552_s23  ;;  %v1506_v5 = vpop.eup %1505 }
 0xa3f   :  { %v746_v6 = vadd.f32 1.0, %v1506_v5 }
 0xa41   :  { %1507 = vrcp.f32 %v746_v6 }
 0xa4b   :  { %v1508_v7 = vpop.eup %1507 }
 0xa4c   :  { %v753_v47 = vmul.f32 %v1508_v7, %v655_v40 }
 0xab0   :  { %v756_v8 = vpop.permute.xlu0 %755 }
 0xab1   :  { %v758_v9 = vmul.f32 %v1508_v7, %v756_v8  ;;  %v193_v7 = vadd.f32 %v1774_v56, %v1785_v1  ;;  %v195_v8 = vadd.f32 %v1779_v58, %v1781_v59  ;;  %v1553_v56 = vmov 0.0|0.0   ;;  %v1094_v58 = vld [vmem:[%s1928_s4] sm:$0xff]  ;;  %v1096_v1 = vld [vmem:[%s1928_s4 + $0x10] sm:$0xff] }
 0xab2   :  { %1407 = vmatprep.subr.bf16.mxu1 %v1553_v56 }
 0xab3   :  { %760 = vrot.lane.b32.xlu1 %v758_v9, %s1552_s23 }
 0xb25   :  { %v761_v48 = vpop.permute.xlu1 %760 }
 0xb26   :  { %v763_v10 = vadd.f32 %v761_v48, %v753_v47 }
 0xb28   :  { %1509 = vtanh.f32 %v763_v10 }
 0xb29   :  { %1511 = vpow2.f32 %v1229_v12 }
 0xb32   :  { %v1510_v11 = vpop.eup %1509 }
 0xb33   :  { %766 = vrot.lane.b32.xlu0 %v1510_v11, %s1552_s23  ;;  %v1512_v13 = vpop.eup %1511 }
 0xb34   :  { %v747_v14 = vadd.f32 1.0, %v1512_v13 }
 0xb36   :  { %1513 = vrcp.f32 %v747_v14 }
 0xb40   :  { %v1514_v15 = vpop.eup %1513 }
 0xba5   :  { %v767_v17 = vpop.permute.xlu0 %766 }
 0xba6   :  { %v769_v19 = vmul.f32 %v1514_v15, %v767_v17 }
 0xba8   :  { %1230 = vmatmul.mubr.msk.f32.vlgmr.msra.gmra.mrb[4].mxu0 %vm231_vm1, %v769_v19 }
 0xba9   :  { %1378 = vmatpush1.bf16.msra.mxu0 %v1640_v18  ;;  %947 = vmatprep.mubr.f32.mxu0 %v1551_v3 }
 0xbaa   :  { %1380 = vmatprep.subr.bf16.mxu0 %v1648_v21 }
 0xbad   :  { %1382 = vmatpush1.bf16.msra.mxu0 %v1669_v27 }
 0xbae   :  { %1384 = vmatprep.subr.bf16.mxu0 %v1678_v30 }
 0xbb1   :  { %1386 = vmatpush1.bf16.msra.mxu0 %v1693_v34 }
 0xbb2   :  { %1388 = vmatprep.subr.bf16.mxu0 %v1703_v37 }
 0xbb5   :  { %1390 = vmatpush1.bf16.msra.mxu0 %v1712_v39 }
 0xbb6   :  { %1392 = vmatprep.subr.bf16.mxu0 %v1635_v16 }
 0xc7b   :  { %v841_v23 = vpop.f32.mrb[4].mxu0 }
 0xc7c   :  { %v846_v24 = vadd.f32 %v841_v23, %v181_v20  ;;  %v843_v25 = vpop.f32.mrb[5].mxu0 }
 0xc7d   :  { %v847_v26 = vadd.f32 %v843_v25, %v183_v22  ;;  %v1097_v22 = vld [vmem:[%s1928_s4 + $0x18] sm:$0xff]  ;;  %v1099_v25 = vld [vmem:[%s1928_s4 + $0x28] sm:$0xff] }
 0xc7e   :  { %v1231_v29 = vmul.f32 -1.442695, %v846_v24  ;;  %v1411_v23 = vpack.c.bf16 %v1097_v22, %v1096_v1  ;;  %v1098_v24 = vld [vmem:[%s1928_s4 + $0x20] sm:$0xff] }
 0xc7f   :  { %1515 = vtanh.f32 %v847_v26  ;;  %v1232_v45 = vmul.f32 -1.442695, %v847_v26  ;;  %v1414_v26 = vpack.c.bf16 %v1099_v25, %v1098_v24 }
 0xc80   :  { %1517 = vpow2.f32 %v1231_v29  ;;  %v1101_v29 = vld [vmem:[%s1928_s4 + $0x38] sm:$0xff] }
 0xc89   :  { %v1516_v28 = vpop.eup %1515 }
 0xc8a   :  { %863 = vrot.lane.b32.xlu1 %v1516_v28, %s1552_s23  ;;  %v1518_v31 = vpop.eup %1517  ;;  %v1100_v28 = vld [vmem:[%s1928_s4 + $0x30] sm:$0xff] }
 0xc8b   :  { %v854_v32 = vadd.f32 1.0, %v1518_v31  ;;  %v1417_v31 = vpack.c.bf16 %v1101_v29, %v1100_v28 }
 0xc8d   :  { %1519 = vrcp.f32 %v854_v32 }
 0xc97   :  { %v1520_v16 = vpop.eup %1519 }
 0xc98   :  { %v861_v50 = vmul.f32 %v1520_v16, %v763_v10 }
 0xcfc   :  { %v864_v33 = vpop.permute.xlu1 %863 }
 0xcfd   :  { %v866_v35 = vmul.f32 %v1520_v16, %v864_v33 }
 0xcff   :  { %868 = vrot.lane.b32.xlu0 %v866_v35, %s1552_s23 }
 0xd71   :  { %v869_v51 = vpop.permute.xlu0 %868 }
 0xd72   :  { %v871_v36 = vadd.f32 %v869_v51, %v861_v50 }
 0xd74   :  { %1521 = vtanh.f32 %v871_v36 }
 0xd75   :  { %1523 = vpow2.f32 %v1232_v45 }
 0xd7e   :  { %v1522_v38 = vpop.eup %1521 }
 0xd7f   :  { %874 = vrot.lane.b32.xlu1 %v1522_v38, %s1552_s23  ;;  %v1524_v46 = vpop.eup %1523 }
 0xd80   :  { %v855_v40 = vadd.f32 1.0, %v1524_v46 }
 0xd82   :  { %1525 = vrcp.f32 %v855_v40  ;;  %v13_v40 = vstv %s1929_s7 }
 0xd83   :  { %14 = vst [vmem:[#allocation3] sm:$0x1] %v13_v40 }
 0xd8c   :  { %v1526_v41 = vpop.eup %1525 }
 0xdf1   :  { %v875_v42 = vpop.permute.xlu1 %874 }
 0xdf2   :  { %v877_v43 = vmul.f32 %v1526_v41, %v875_v42 }
 0xdf4   :  { %1233 = vmatmul.mubr.msk.f32.vlgmr.msra.gmra.mrb[6].mxu0 %vm231_vm1, %v877_v43 }
 0xdf5   :  { %1394 = vmatpush1.bf16.msra.mxu0 %v1640_v18  ;;  %1055 = vmatprep.mubr.f32.mxu0 %v1551_v3  ;;  %v189_v18 = vadd.f32 %v1772_v54, %v1781_v59  ;;  %v1095_v59 = vld [vmem:[%s1928_s4 + $0x8] sm:$0xff]  ;;  %v1239_v3 = vld [vmem:[%s1930_s5] ss:$0 sm:$0xff] }
 0xdf6   :  { %1396 = vmatprep.subr.bf16.mxu0 %v1648_v21  ;;  %v1408_v20 = vpack.c.bf16 %v1095_v59, %v1094_v58 }
 0xdf8   :  { %1409 = vmatpush3.bf16.msra.mxu1 %v1408_v20 }
 0xdf9   :  { %1398 = vmatpush1.bf16.msra.mxu0 %v1669_v27  ;;  %1410 = vmatprep.subr.bf16.mxu1 %v1553_v56 }
 0xdfa   :  { %1400 = vmatprep.subr.bf16.mxu0 %v1678_v30 }
 0xdfc   :  { %1412 = vmatpush3.bf16.msra.mxu1 %v1411_v23 }
 0xdfd   :  { %1402 = vmatpush1.bf16.msra.mxu0 %v1693_v34  ;;  %1413 = vmatprep.subr.bf16.mxu1 %v1553_v56 }
 0xdfe   :  { %1404 = vmatprep.subr.bf16.mxu0 %v1703_v37 }
 0xe00   :  { %1415 = vmatpush3.bf16.msra.mxu1 %v1414_v26 }
 0xe01   :  { %1406 = vmatpush1.bf16.msra.mxu0 %v1712_v39  ;;  %1416 = vmatprep.subr.bf16.mxu1 %v1553_v56 }
 0xe04   :  { %1418 = vmatpush3.bf16.msra.mxu1 %v1417_v31 }
 0xec7   :  { %v949_v49 = vpop.f32.mrb[6].mxu0 }
 0xec8   :  { %v954_v52 = vadd.f32 %v949_v49, %v187_v44  ;;  %v951_v55 = vpop.f32.mrb[7].mxu0  ;;  %v1241_v44 = vld [vmem:[%s1931_s6] ss:$0 sm:$0xff] }
 0xec9   :  { %v955_v21 = vadd.f32 %v951_v55, %v189_v18  ;;  %v1242_v55 = vld [vmem:[#allocation3] ss:$0 sm:$0xff] }
 0xeca   :  { %v1234_v30 = vmul.f32 -1.442695, %v954_v52 }
 0xecb   :  { %1527 = vtanh.f32 %v955_v21  ;;  %v1235_v63 = vmul.f32 -1.442695, %v955_v21 }
 0xecc   :  { %1529 = vpow2.f32 %v1234_v30 }
 0xed5   :  { %v1528_v27 = vpop.eup %1527 }
 0xed6   :  { %971 = vrot.lane.b32.xlu0 %v1528_v27, %s1552_s23  ;;  %v1530_v34 = vpop.eup %1529 }
 0xed7   :  { %v962_v37 = vadd.f32 1.0, %v1530_v34 }
 0xed9   :  { %1531 = vrcp.f32 %v962_v37 }
 0xee3   :  { %v1532_v39 = vpop.eup %1531 }
 0xee4   :  { %v969_v53 = vmul.f32 %v1532_v39, %v871_v36 }
 0xf48   :  { %v972_v57 = vpop.permute.xlu0 %971 }
 0xf49   :  { %v974_v60 = vmul.f32 %v1532_v39, %v972_v57 }
 0xf4b   :  { %976 = vrot.lane.b32.xlu1 %v974_v60, %s1552_s23 }
 0xfbd   :  { %v977_v54 = vpop.permute.xlu1 %976 }
 0xfbe   :  { %v979_v61 = vadd.f32 %v977_v54, %v969_v53 }
 0xfc0   :  { %1533 = vtanh.f32 %v979_v61 }
 0xfc1   :  { %1535 = vpow2.f32 %v1235_v63 }
 0xfca   :  { %v1534_v62 = vpop.eup %1533 }
 0xfcb   :  { %982 = vrot.lane.b32.xlu0 %v1534_v62, %s1552_s23  ;;  %v1536_v0 = vpop.eup %1535 }
 0xfcc   :  { %v963_v2 = vadd.f32 1.0, %v1536_v0 }
 0xfce   :  { %1537 = vrcp.f32 %v963_v2 }
 0xfd8   :  { %v1538_v4 = vpop.eup %1537 }
0x103d   :  { %v983_v5 = vpop.permute.xlu0 %982 }
0x103e   :  { %v985_v6 = vmul.f32 %v1538_v4, %v983_v5 }
0x1040   :  { %1236 = vmatmul.mubr.msk.f32.vlgmr.msra.gmra.mrb[8].mxu0 %vm231_vm1, %v985_v6 }
0x1113   :  { %v1057_v9 = vpop.f32.mrb[8].mxu0 }
0x1114   :  { %v1062_v47 = vadd.f32 %v1057_v9, %v193_v7  ;;  %v1059_v48 = vpop.f32.mrb[9].mxu0 }
0x1115   :  { %v1063_v10 = vadd.f32 %v1059_v48, %v195_v8 }
0x1116   :  { %v1237_v12 = vmul.f32 -1.442695, %v1062_v47 }
0x1117   :  { %1539 = vtanh.f32 %v1063_v10  ;;  %v1238_v50 = vmul.f32 -1.442695, %v1063_v10 }
0x1118   :  { %1541 = vpow2.f32 %v1237_v12 }
0x1121   :  { %v1540_v11 = vpop.eup %1539 }
0x1122   :  { %1079 = vrot.lane.b32.xlu1 %v1540_v11, %s1552_s23  ;;  %v1542_v13 = vpop.eup %1541 }
0x1123   :  { %v1070_v14 = vadd.f32 1.0, %v1542_v13 }
0x1125   :  { %1543 = vrcp.f32 %v1070_v14 }
0x112f   :  { %v1544_v15 = vpop.eup %1543 }
0x1130   :  { %v1077_v32 = vmul.f32 %v1544_v15, %v979_v61 }
0x1194   :  { %v1080_v17 = vpop.permute.xlu1 %1079 }
0x1195   :  { %v1082_v19 = vmul.f32 %v1544_v15, %v1080_v17 }
0x1197   :  { %1084 = vrot.lane.b32.xlu0 %v1082_v19, %s1552_s23 }
0x1209   :  { %v1085_v16 = vpop.permute.xlu0 %1084 }
0x120a   :  { %v1087_v33 = vadd.f32 %v1085_v16, %v1077_v32 }
0x120c   :  { %1545 = vtanh.f32 %v1087_v33 }
0x120d   :  { %1547 = vpow2.f32 %v1238_v50 }
0x1216   :  { %v1546_v35 = vpop.eup %1545 }
0x1217   :  { %1090 = vrot.lane.b32.xlu1 %v1546_v35, %s1552_s23  ;;  %v1548_v51 = vpop.eup %1547 }
0x1218   :  { %v1071_v36 = vadd.f32 1.0, %v1548_v51 }
0x121a   :  { %1549 = vrcp.f32 %v1071_v36 }
0x1224   :  { %v1550_v38 = vpop.eup %1549 }
0x1289   :  { %v1091_v45 = vpop.permute.xlu1 %1090 }
0x128a   :  { %v1093_v46 = vmul.f32 %v1550_v38, %v1091_v45 }
0x128c   :  { %1269 = vmatmul.mubr.msk.f32.vlgmr.msra.gmra.mrb[16].mxu1 %vm231_vm1, %v1093_v46 }
0x135f   :  { %v1178_v41 = vpop.f32.mrb[16].mxu1 }
0x1360   :  { %v1179_v42 = vadd.f32 %v1239_v3, %v1178_v41  ;;  %v1270_v43 = vpop.f32.mrb[17].mxu1 }
0x1362   :  { %v1182_v18 = vmax.f32 %v1179_v42, 0.0 }
0x1364   :  { %v1190_v49 = vmul.f32 %v1241_v44, %v1182_v18 }
0x1366   :  { %v1191_v52 = vsel %vm59_vm0, %v1190_v49, 0.0 }
0x1367   :  { %1192 = vadd.xlane.f32.xlu0 %v1191_v52 }
0x13f4   :  { %v1193_v21 = vpop.xlane.xlu0 %1192 }
0x13f5   :  { %v1201_v27 = vadd.f32 %v1242_v55, %v1193_v21 }
0x13f7   :  { %1203 = vst.msk [vmem:[%s1932_s8] sm:$0xff] %vm1202_vm3, %v1201_v27 }

</bundles_post_ra>
